<compile_context>
chip_gen: v7x
topology: tpu7x:2x2x1
jax: 0.10.0
libtpu: 0.0.40
codegen_flags: <defaults>
</compile_context>

<pallas_src>
import functools

import jax
import jax.numpy as jnp
from jax.experimental import pallas as pl
from jax.experimental.pallas import tpu as pltpu


def _round_up(x, m):
    return ((x + m - 1) // m) * m


def dence_kernel(x_ref, w_ref, b_ref, o_ref, acc_ref):
    """One (TM, TK) x-tile @ (TK, O) weight-tile step with K-accumulation.

    grid = (num_m_tiles, num_k_tiles); K is the last ("arbitrary") axis.
    """
    k = pl.program_id(1)

    @pl.when(k == 0)
    def _():
        acc_ref[...] = jnp.zeros_like(acc_ref)

    # MXU matmul, f32 accumulation regardless of input dtype (f32 or bf16).
    acc_ref[...] += jnp.dot(
        x_ref[...], w_ref[...], preferred_element_type=jnp.float32
    )

    @pl.when(k == pl.num_programs(1) - 1)
    def _():
        # Epilogue in f32: bias add + Swish (y * sigmoid(y)), then cast.
        y = acc_ref[...] + b_ref[...]
        o_ref[...] = (y * jax.nn.sigmoid(y)).astype(o_ref.dtype)


def dence_forward(x, w, b, *, block_m=256, block_k=512, compute_dtype=None,
                  out_dtype=None):
    """Fused Linear + Swish.

    x: (B, i_dim)            activations
    w: (o_dim, i_dim)        PyTorch nn.Linear weight layout
    b: (o_dim,)              PyTorch nn.Linear bias
    returns: (B, o_dim) == swish(x @ w.T + b)
    """
    B, i_dim = x.shape
    o_dim, i_dim_w = w.shape
    assert i_dim_w == i_dim
    out_dtype = out_dtype or x.dtype
    cdt = compute_dtype or x.dtype

    # --- padded / tiled geometry -------------------------------------------
    # Lane dims (i_dim for x, o_dim for W/out) padded to multiples of 128 so
    # loads/stores are unmasked and MXU columns are fully used.
    i_pad = _round_up(i_dim, 128)
    o_pad = _round_up(o_dim, 128)
    tm = min(_round_up(B, 8), block_m)          # batch tile, multiple of 8
    b_pad = _round_up(B, tm)
    tk = min(i_pad, _round_up(block_k, 128))    # K tile, multiple of 128

    # Zero padding: padded K rows/cols contribute 0 to the dot; padded M rows
    # and padded O columns are sliced off at the end.
    x_p = jnp.pad(x.astype(cdt), ((0, b_pad - B), (0, i_pad - i_dim)))
    w_t = jnp.pad(w.T.astype(cdt), ((0, i_pad - i_dim), (0, o_pad - o_dim)))
    b2d = jnp.pad(b.astype(jnp.float32), (0, o_pad - o_dim)).reshape(1, o_pad)

    grid = (b_pad // tm, i_pad // tk)

    out = pl.pallas_call(
        dence_kernel,
        out_shape=jax.ShapeDtypeStruct((b_pad, o_pad), out_dtype),
        grid=grid,
        in_specs=[
            # x tile moves with (m, k); W tile moves with k only; bias resident.
            pl.BlockSpec((tm, tk), lambda i, k: (i, k)),
            pl.BlockSpec((tk, o_pad), lambda i, k: (k, 0)),
            pl.BlockSpec((1, o_pad), lambda i, k: (0, 0)),
        ],
        out_specs=pl.BlockSpec((tm, o_pad), lambda i, k: (i, 0)),
        scratch_shapes=[pltpu.VMEM((tm, o_pad), jnp.float32)],
        compiler_params=pltpu.CompilerParams(
            # batch axis parallel (megacore on v7x, no-op on v5e/v6e);
            # K reduction axis arbitrary (accumulator carried across it).
            dimension_semantics=("parallel", "arbitrary"),
            vmem_limit_bytes=48 << 20,
        ),
    )(x_p, w_t, b2d)

    return out[:B, :o_dim]


if __name__ == "__main__":
    key = jax.random.PRNGKey(0)

    # ---------- case 1: toy shape consistent with the module (f32) ----------
    B, I_DIM, O_DIM = 8, 32, 64
    kx, kw, kb, k2 = jax.random.split(key, 4)

    x = jax.random.normal(kx, (B, I_DIM), dtype=jnp.float32)
    bound = 1.0 / (I_DIM ** 0.5)
    w = jax.random.uniform(kw, (O_DIM, I_DIM), minval=-bound, maxval=bound,
                           dtype=jnp.float32)   # PyTorch layout (o_dim, i_dim)
    b = jax.random.uniform(kb, (O_DIM,), minval=-bound, maxval=bound,
                           dtype=jnp.float32)

    out = jax.block_until_ready(dence_forward(x, w, b))
    y_ref = x @ w.T + b
    ref = y_ref * jax.nn.sigmoid(y_ref)
    assert out.shape == (B, O_DIM)
    assert jnp.allclose(out, ref, atol=1e-5, rtol=1e-5)

    # ---------- case 2: uneven, tiled shape with bf16 MXU inputs ------------
    B2, I2, O2 = 300, 200, 130          # exercises padding + multiple M tiles
    kx2, kw2, kb2 = jax.random.split(k2, 3)
    x2 = jax.random.normal(kx2, (B2, I2), dtype=jnp.float32)
    bound2 = 1.0 / (I2 ** 0.5)
    w2 = jax.random.uniform(kw2, (O2, I2), minval=-bound2, maxval=bound2,
                            dtype=jnp.float32)
    b2 = jax.random.uniform(kb2, (O2,), minval=-bound2, maxval=bound2,
                            dtype=jnp.float32)

    out2 = jax.block_until_ready(
        dence_forward(x2, w2, b2, block_m=128, compute_dtype=jnp.bfloat16)
    )
    # Reference with the same bf16-cast inputs (f32 accumulation).
    xb = x2.astype(jnp.bfloat16).astype(jnp.float32)
    wb = w2.astype(jnp.bfloat16).astype(jnp.float32)
    y2 = xb @ wb.T + b2
    ref2 = y2 * jax.nn.sigmoid(y2)
    assert out2.shape == (B2, O2)
    assert jnp.allclose(out2, ref2, atol=2e-2, rtol=2e-2)

    print("KERNEL_OK")
</pallas_src>

<mosaic_0001>
module attributes {stable_mosaic.version = 11 : i64} {
  func.func @dence_kernel(%arg0: i32, %arg1: i32, %arg2: memref<8x128xf32, #tpu.memory_space<vmem>>, %arg3: memref<128x128xf32, #tpu.memory_space<vmem>>, %arg4: memref<1x128xf32, #tpu.memory_space<vmem>>, %arg5: memref<8x128xf32, #tpu.memory_space<vmem>>, %arg6: memref<8x128xf32, #tpu.memory_space<vmem>>) attributes {dimension_semantics = [#tpu.dimension_semantics<parallel>, #tpu.dimension_semantics<arbitrary>], iteration_bounds = array<i64: 1, 1>, scalar_prefetch = 0 : i64, scratch_operands = 1 : i64, tpu.core_type = #tpu.core_type<tc>, window_params = [{transform_indices = @transform_0, window_bounds = array<i64: 8, 128>}, {transform_indices = @transform_1, window_bounds = array<i64: 128, 128>}, {pipeline_mode = #tpu.pipeline_mode<synchronous>, transform_indices = @transform_2, window_bounds = array<i64: 1, 128>}, {transform_indices = @transform_3, window_bounds = array<i64: 8, 128>}]} {
    %c0_i32 = arith.constant 0 : i32
    %0 = arith.cmpi eq, %arg1, %c0_i32 : i32
    %1 = arith.extui %0 : i1 to i32
    %c0_i32_0 = arith.constant 0 : i32
    %2 = arith.cmpi ne, %1, %c0_i32_0 : i32
    scf.if %2 {
      %cst_10 = arith.constant 0.000000e+00 : f32
      %12 = vector.broadcast %cst_10 : f32 to vector<8x128xf32>
      %c0_11 = arith.constant 0 : index
      %c0_12 = arith.constant 0 : index
      %13 = vector.load %arg6[%c0_11, %c0_12] : memref<8x128xf32, #tpu.memory_space<vmem>>, vector<8x128xf32>
      tpu.vector_store %arg6[%c0_11, %c0_12], %12 {strides = array<i32>} : memref<8x128xf32, #tpu.memory_space<vmem>>, vector<8x128xf32>,
    } else {
    }
    %c0 = arith.constant 0 : index
    %c0_1 = arith.constant 0 : index
    %3 = vector.load %arg6[%c0, %c0_1] : memref<8x128xf32, #tpu.memory_space<vmem>>, vector<8x128xf32>
    %c0_2 = arith.constant 0 : index
    %c0_3 = arith.constant 0 : index
    %4 = vector.load %arg2[%c0_2, %c0_3] : memref<8x128xf32, #tpu.memory_space<vmem>>, vector<8x128xf32>
    %c0_4 = arith.constant 0 : index
    %c0_5 = arith.constant 0 : index
    %5 = vector.load %arg3[%c0_4, %c0_5] : memref<128x128xf32, #tpu.memory_space<vmem>>, vector<128x128xf32>
    %cst = arith.constant dense<0.000000e+00> : vector<8x128xf32>
    %6 = tpu.matmul %4, %5, %cst {dimension_numbers = #tpu.dot_dimension_numbers<[1], [0], [0], [1], [0, 0, 1, 1], [], []>} : vector<8x128xf32>, vector<128x128xf32>, vector<8x128xf32> -> vector<8x128xf32>
    %7 = arith.addf %3, %6 : vector<8x128xf32>
    %c0_6 = arith.constant 0 : index
    %c0_7 = arith.constant 0 : index
    %8 = vector.load %arg6[%c0_6, %c0_7] : memref<8x128xf32, #tpu.memory_space<vmem>>, vector<8x128xf32>
    tpu.vector_store %arg6[%c0_6, %c0_7], %7 {strides = array<i32>} : memref<8x128xf32, #tpu.memory_space<vmem>>, vector<8x128xf32>,
    %c0_i32_8 = arith.constant 0 : i32
    %9 = arith.cmpi eq, %arg1, %c0_i32_8 : i32
    %10 = arith.extui %9 : i1 to i32
    %c0_i32_9 = arith.constant 0 : i32
    %11 = arith.cmpi ne, %10, %c0_i32_9 : i32
    scf.if %11 {
      %c0_10 = arith.constant 0 : index
      %c0_11 = arith.constant 0 : index
      %12 = vector.load %arg6[%c0_10, %c0_11] : memref<8x128xf32, #tpu.memory_space<vmem>>, vector<8x128xf32>
      %c0_12 = arith.constant 0 : index
      %c0_13 = arith.constant 0 : index
      %13 = vector.load %arg4[%c0_12, %c0_13] : memref<1x128xf32, #tpu.memory_space<vmem>>, vector<1x128xf32>
      %14 = vector.broadcast %13 : vector<1x128xf32> to vector<8x128xf32>
      %15 = arith.addf %12, %14 : vector<8x128xf32>
      %16 = arith.negf %15 : vector<8x128xf32>
      %17 = math.exp %16 : vector<8x128xf32>
      %cst_14 = arith.constant 1.000000e+00 : f32
      %18 = vector.broadcast %cst_14 : f32 to vector<8x128xf32>
      %19 = arith.addf %18, %17 : vector<8x128xf32>
      %20 = arith.divf %18, %19 : vector<8x128xf32>
      %21 = arith.mulf %15, %20 : vector<8x128xf32>
      %c0_15 = arith.constant 0 : index
      %c0_16 = arith.constant 0 : index
      %22 = vector.load %arg5[%c0_15, %c0_16] : memref<8x128xf32, #tpu.memory_space<vmem>>, vector<8x128xf32>
      tpu.vector_store %arg5[%c0_15, %c0_16], %21 {strides = array<i32>} : memref<8x128xf32, #tpu.memory_space<vmem>>, vector<8x128xf32>,
    } else {
    }
    return
  }
  func.func @transform_0(%arg0: i32, %arg1: i32) -> (i32, i32) {
    %c0_i32 = arith.constant 0 : i32
    return %arg0, %arg1 : i32, i32
  }
  func.func @transform_1(%arg0: i32, %arg1: i32) -> (i32, i32) {
    %c0_i32 = arith.constant 0 : i32
    %c0_i32_0 = arith.constant 0 : i32
    return %arg1, %c0_i32 : i32, i32
  }
  func.func @transform_2(%arg0: i32, %arg1: i32) -> (i32, i32) {
    %c0_i32 = arith.constant 0 : i32
    %c0_i32_0 = arith.constant 0 : i32
    %c0_i32_1 = arith.constant 0 : i32
    return %c0_i32, %c0_i32_0 : i32, i32
  }
  func.func @transform_3(%arg0: i32, %arg1: i32) -> (i32, i32) {
    %c0_i32 = arith.constant 0 : i32
    %c0_i32_0 = arith.constant 0 : i32
    return %arg0, %c0_i32 : i32, i32
  }
}

</mosaic_0001>

<bundles_post_ra>
// kernel: tpu_custom_call.1
= control target key start
LH: loop header
LB: loop body
LE: loop exit
PB: predicated region body
PF: predicated region fallthrough
CT: control target
= control target key end

     0   :  { %8 = vsyncpa [#allocation4], 0  ;;  %s408_s0 = inlined_call_operand.hbm [shape: f32[8,128], index: 0, kind: input, shape index: {}]   ;;  %s409_s1 = inlined_call_operand.hbm [shape: f32[128,128], index: 1, kind: input, shape index: {}]   ;;  %s410_s2 = inlined_call_operand.vmem [shape: f32[1,128], index: 2, kind: input, shape index: {}]   ;;  %s411_s3 = inlined_call_operand.hbm [shape: f32[8,128], index: 3, kind: output, shape index: {}]  }
   0x1   :  { %9 = vsyncpa [#allocation7], 0 }
   0x2   :  { %10 = vsyncpa [#allocation5], 0  ;;  %s334_s12 = smov [#allocation3]   ;;  %s335_s14 = smov [#allocation6]  }
   0x3   :  { %s17_s13 = sshll.u32 %s334_s12, 4  ;;  %s26_s15 = sshll.u32 %s335_s14, 4  ;;  %s18_s13 = int_to_ptr.vmem [resolvable:$true] %s17_s13  ;;  %s362_s15 = int_to_ptr.vmem [resolvable:$true] %s26_s15 }
   0x4   :  { %s262_s18 = scalar_lea.hbm %s408_s0, 128 }
   0x5   :  { %p263_p0 = scmp.ne.s32.totalorder %s408_s0, %s262_s18  ;;  %p266_p1 = scmp.lt.u32.totalorder %s262_s18, %s408_s0 }
   0x7   :  { %p268_p2 = pnand %p266_p1, %p263_p0 }
   0x9   :  { %271 = shalt.err (!%p268_p2)
}
   0xa   :  { %s272_s23 = scalar_lea.vmem %s18_s13, 128  ;;  %p277_p4 = scmp.lt.s32.totalorder %s18_s13, %s18_s13 }
   0xb   :  { %p273_p3 = scmp.ne.s32.totalorder %s18_s13, %s272_s23  ;;  %p278_p5 = scmp.lt.s32.totalorder %s272_s23, %s272_s23 }
   0xd   :  { %p279_p6 = por %p278_p5, %p277_p4 }
   0xf   :  { %p280_p7 = pnand %p279_p6, %p273_p3 }
  0x11   :  { %283 = shalt.err (!%p280_p7)
}
  0x12   :  { %20 = dma.hbm_to_vmem [thread:$0]  %s408_s0, 128, %s18_s13, [#allocation4]  }
  0x13   :  { %s284_s28 = scalar_lea.hbm %s409_s1, 2048 }
  0x14   :  { %p285_p8 = scmp.ne.s32.totalorder %s409_s1, %s284_s28  ;;  %p288_p9 = scmp.lt.u32.totalorder %s284_s28, %s409_s1 }
  0x16   :  { %p290_p10 = pnand %p288_p9, %p285_p8 }
  0x18   :  { %293 = shalt.err (!%p290_p10)
}
  0x19   :  { %s294_s6 = scalar_lea.vmem %s362_s15, 2048  ;;  %p299_p12 = scmp.lt.s32.totalorder %s362_s15, %s362_s15 }
  0x1a   :  { %p295_p11 = scmp.ne.s32.totalorder %s362_s15, %s294_s6  ;;  %p300_p13 = scmp.lt.s32.totalorder %s294_s6, %s294_s6 }
  0x1c   :  { %p301_p0 = por %p300_p13, %p299_p12 }
  0x1e   :  { %p302_p1 = pnand %p301_p0, %p295_p11 }
  0x20   :  { %305 = shalt.err (!%p302_p1)
}
  0x21   :  { %s336_s0 = smov 128   ;;  %s337_s7 = smov 8  }
  0x22   :  { %32 = dma.hbm_to_vmem [thread:$0]  %s409_s1, 2048, %s362_s15, [#allocation7], %s336_s0, %s336_s0, %s337_s7  }
  0x23   :  { %328 = dma.done.wait [#allocation4], 128  }
  0x24   :  { %329 = vsyncadd [#allocation4], 4294967168 }
  0x25   :  { %330 = dma.done.wait [#allocation7], 2048  }
  0x26   :  { %331 = vsyncadd [#allocation7], 4294965248  ;;  %v338_v0 = vmov 0.0|0.0   ;;  %vm339_vm0 = vmmov 0   ;;  %v340_v1 = vmov 0.0   ;;  %v48_v2 = vld [vmem:[#allocation6] sm:$0xff] }
  0x27   :  { %226 = vmatprep.subr.bf16.mxu0 %v338_v0  ;;  %223 = vmatprep.mubr.msk.f32.mxu0 %vm339_vm0, %v340_v1  ;;  %v49_v3 = vld [vmem:[#allocation6 + $0x8] sm:$0xff]  ;;  %v50_v4 = vld [vmem:[#allocation6 + $0x10] sm:$0xff]  ;;  %v51_v6 = vld [vmem:[#allocation6 + $0x18] sm:$0xff]  ;;  %s341_s11 = smov [#allocation8]  }
  0x28   :  { %v227_v5 = vpack.c.bf16 %v49_v3, %v48_v2  ;;  %v230_v7 = vpack.c.bf16 %v51_v6, %v50_v4  ;;  %v52_v8 = vld [vmem:[#allocation6 + $0x20] sm:$0xff]  ;;  %v53_v9 = vld [vmem:[#allocation6 + $0x28] sm:$0xff]  ;;  %v54_v11 = vld [vmem:[#allocation6 + $0x30] sm:$0xff]  ;;  %s162_s12 = sshll.u32 %s341_s11, 4  ;;  %s163_s12 = int_to_ptr.vmem [resolvable:$true] %s162_s12 }
  0x29   :  { %v233_v10 = vpack.c.bf16 %v53_v9, %v52_v8  ;;  %v55_v12 = vld [vmem:[#allocation6 + $0x38] sm:$0xff]  ;;  %v56_v14 = vld [vmem:[#allocation6 + $0x40] sm:$0xff]  ;;  %v57_v15 = vld [vmem:[#allocation6 + $0x48] sm:$0xff]  ;;  %s306_s13 = scalar_lea.vmem %s163_s12, 128  ;;  %p311_p3 = scmp.lt.s32.totalorder %s163_s12, %s163_s12 }
  0x2a   :  { %228 = vmatpush3.bf16.msra.mxu0 %v227_v5  ;;  %v236_v13 = vpack.c.bf16 %v55_v12, %v54_v11  ;;  %v239_v16 = vpack.c.bf16 %v57_v15, %v56_v14  ;;  %v58_v17 = vld [vmem:[#allocation6 + $0x50] sm:$0xff]  ;;  %v59_v18 = vld [vmem:[#allocation6 + $0x58] sm:$0xff]  ;;  %v60_v20 = vld [vmem:[#allocation6 + $0x60] sm:$0xff]  ;;  %p307_p2 = scmp.ne.s32.totalorder %s163_s12, %s306_s13  ;;  %p312_p4 = scmp.lt.s32.totalorder %s306_s13, %s306_s13 }
  0x2b   :  { %229 = vmatprep.subr.bf16.mxu0 %v338_v0  ;;  %v242_v19 = vpack.c.bf16 %v59_v18, %v58_v17  ;;  %v61_v21 = vld [vmem:[#allocation6 + $0x68] sm:$0xff]  ;;  %v62_v23 = vld [vmem:[#allocation6 + $0x70] sm:$0xff]  ;;  %v63_v24 = vld [vmem:[#allocation6 + $0x78] sm:$0xff] }
  0x2c   :  { %v245_v22 = vpack.c.bf16 %v61_v21, %v60_v20  ;;  %v248_v25 = vpack.c.bf16 %v63_v24, %v62_v23  ;;  %v47_v26 = vld [vmem:[#allocation3] sm:$0xff]  ;;  %p313_p5 = por %p312_p4, %p311_p3 }
  0x2d   :  { %v172_v27 = vld [vmem:[%s410_s2] ss:$0 sm:$0xff] }
  0x2e   :  { %231 = vmatpush3.bf16.msra.mxu0 %v230_v7  ;;  %p314_p6 = pnand %p313_p5, %p307_p2 }
  0x2f   :  { %232 = vmatprep.subr.bf16.mxu0 %v338_v0 }
  0x32   :  { %234 = vmatpush3.bf16.msra.mxu0 %v233_v10 }
  0x33   :  { %235 = vmatprep.subr.bf16.mxu0 %v338_v0 }
  0x36   :  { %237 = vmatpush3.bf16.msra.mxu0 %v236_v13 }
  0x37   :  { %238 = vmatprep.subr.bf16.mxu0 %v338_v0 }
  0x3a   :  { %240 = vmatpush3.bf16.msra.mxu0 %v239_v16 }
  0x3b   :  { %241 = vmatprep.subr.bf16.mxu0 %v338_v0 }
  0x3e   :  { %243 = vmatpush3.bf16.msra.mxu0 %v242_v19 }
  0x3f   :  { %244 = vmatprep.subr.bf16.mxu0 %v338_v0 }
  0x42   :  { %246 = vmatpush3.bf16.msra.mxu0 %v245_v22 }
  0x43   :  { %247 = vmatprep.subr.bf16.mxu0 %v338_v0 }
  0x46   :  { %249 = vmatpush3.bf16.msra.mxu0 %v248_v25 }
  0x49   :  { %224 = vmatmul.mubr.f32.vlgmr.msra.gmra.mrb[0].mxu0 %v47_v26 }
 0x11c   :  { %v130_v28 = vpop.f32.mrb[0].mxu0 }
 0x11d   :  { %v147_v29 = vadd.f32 %v172_v27, %v130_v28  ;;  %v225_v30 = vpop.f32.mrb[1].mxu0 }
 0x11f   :  { %v173_v31 = vmul.f32 -1.442695, %v147_v29 }
 0x121   :  { %258 = vpow2.f32 %v173_v31 }
 0x12b   :  { %v259_v32 = vpop.eup %258 }
 0x12c   :  { %v151_v33 = vadd.f32 1.0, %v259_v32 }
 0x12e   :  { %260 = vrcp.f32 %v151_v33 }
 0x138   :  { %v261_v34 = vpop.eup %260 }
 0x139   :  { %v154_v35 = vmul.f32 %v261_v34, %v147_v29 }
 0x13b   :  { %155 = vst [vmem:[#allocation8] sm:$0xff] %v154_v35 }
 0x13c   :  { %317 = shalt.err (!%p314_p6)
}
 0x13d   :  { %s318_s15 = scalar_lea.hbm %s411_s3, 128 }
 0x13e   :  { %p319_p7 = scmp.ne.s32.totalorder %s411_s3, %s318_s15  ;;  %p322_p8 = scmp.lt.u32.totalorder %s318_s15, %s411_s3 }
 0x140   :  { %p324_p9 = pnand %p322_p8, %p319_p7 }
 0x142   :  { %327 = shalt.err (!%p324_p9)
}
 0x143   :  { %165 = dma.vmem_to_hbm [thread:$0]  %s163_s12, 128, %s411_s3, [#allocation5]  }
 0x144   :  { %332 = dma.done.wait [#allocation5], 128  }
 0x145   :  { %333 = vsyncadd [#allocation5], 4294967168 }
 0x146   :  { %169 = vsyncpa [#allocation4], 1 }
 0x147   :  { %170 = vsyncpa [#allocation7], 1 }
 0x148   :  { %171 = vsyncpa [#allocation5], 1 }

</bundles_post_ra>
